<compile_context>
chip_gen: v7x
topology: tpu7x:2x2x1
jax: 0.10.0
libtpu: 0.0.40
codegen_flags: <defaults>
</compile_context>

<pallas_src>
import functools

import jax
import jax.numpy as jnp
from jax.experimental import pallas as pl
from jax.experimental.pallas import tpu as pltpu


# ----------------------------------------------------------------------------
# Kernel: two MXU matmuls + bias + ReLU over one batch tile.
# ----------------------------------------------------------------------------
def _mlp_kernel(x_ref, w1_ref, b1_ref, w2_ref, b2_ref, o_ref, *, use_bf16):
    x = x_ref[...]                                     # (TB, L*C) f32
    if use_bf16:
        # bf16 operands, f32 accumulation (single-pass on v6e/v7x MXU).
        h = jnp.dot(x.astype(jnp.bfloat16), w1_ref[...],
                    preferred_element_type=jnp.float32)
        h = jnp.maximum(h + b1_ref[...], 0.0)
        o = jnp.dot(h.astype(jnp.bfloat16), w2_ref[...],
                    preferred_element_type=jnp.float32)
    else:
        # Exact-f32 path (explicit, not the accidental default-precision mix).
        h = jnp.dot(x, w1_ref[...], preferred_element_type=jnp.float32,
                    precision=jax.lax.Precision.HIGHEST)
        h = jnp.maximum(h + b1_ref[...], 0.0)
        o = jnp.dot(h, w2_ref[...], preferred_element_type=jnp.float32,
                    precision=jax.lax.Precision.HIGHEST)
    o = jnp.maximum(o + b2_ref[...], 0.0)
    o_ref[...] = o.astype(o_ref.dtype)


# ----------------------------------------------------------------------------
# Host-side parameter folding and helpers.
# ----------------------------------------------------------------------------
def _fold_conv_into_linear(conv_w, conv_b, w1, b1, L):
    """Fold Conv1d(4,4,3,padding=1) + permute + reshape into the first Linear.

    flat_in[b, t*C + ci] = x[b, t, ci]
    flat_cv[b, t*C + co] = conv_b[co] + sum_{ci,k} conv_w[co,ci,k]*x[b,t+k-1,ci]
                         = (flat_in @ C_band + bias_vec)[b, t*C + co]
    first Linear output  = flat_in @ (C_band @ w1) + (bias_vec @ w1 + b1)
    """
    C_out, C_in, K = conv_w.shape
    cband = jnp.zeros((L * C_in, L * C_out), dtype=jnp.float32)
    for t in range(L):
        for k in range(K):
            tp = t + k - 1                      # padding = 1
            if 0 <= tp < L:
                blk = conv_w[:, :, k].T         # [ci, co]
                cband = cband.at[tp * C_in:(tp + 1) * C_in,
                                 t * C_out:(t + 1) * C_out].set(blk)
    bias_vec = jnp.tile(conv_b, L)              # [t*C + co] = conv_b[co]
    w_eff = cband @ w1                          # (L*C, D1)
    b_eff = bias_vec @ w1 + b1                  # (D1,)
    return w_eff, b_eff


def _round_up(x, m):
    return ((x + m - 1) // m) * m


def _pad_cols(a, n):
    pad = n - a.shape[-1]
    if pad == 0:
        return a
    widths = [(0, 0)] * (a.ndim - 1) + [(0, pad)]
    return jnp.pad(a, widths)


def _choose_batch_tile(B):
    """Large tiles (fewer grid steps, cheap DMAs) but bounded for v7x VMEM,
    and >= ~4 tiles when possible so 'parallel' shards across TensorCores."""
    MAX_TB = 8192
    if B <= 1024:
        return B                      # single block; block dim == array dim
    tb = min(MAX_TB, _round_up(-(-B // 4), 256))
    return max(tb, 1024)


# ----------------------------------------------------------------------------
# Public wrapper (mirrors SlideWindowEstimator.forward).
# ----------------------------------------------------------------------------
def slide_window_estimator(x, conv_w, conv_b, w1, b1, w2, b2, *, w0=None,
                           batch_tile=None, use_bf16=True,
                           min_pallas_batch=1024):
    """x: (B, L, 4) float32.  Returns (p0, x_out, w0) like the torch module."""
    B, L, C = x.shape
    assert C == 4 and conv_w.shape == (4, 4, 3)
    D1 = w1.shape[1]
    D2 = w2.shape[1]
    LC = L * C

    # Trivial outputs stay in plain XLA (no tiny masked stores in-kernel).
    p0 = x[:, 0:1, 1:4]
    if w0 is None:
        w0 = jnp.zeros((B, 1, 3), dtype=x.dtype)

    # Fold the conv into the first Linear (once per parameter set).
    w_eff, b_eff = _fold_conv_into_linear(conv_w, conv_b, w1, b1, L)

    flat = x.reshape(B, LC)                       # free row-major view

    # Fast path: tiny batches are cheaper fully fused in XLA than via a
    # pallas_call launch + DMA pipeline.
    if B < min_pallas_batch:
        h = jnp.maximum(flat @ w_eff + b_eff, 0.0)
        o = jnp.maximum(h @ w2 + b2, 0.0)
        return p0, o.reshape(B, 1, D2), w0

    # Lane-dense hidden dim (pad to multiple of 128).  Exact: padded columns of
    # w1/b1 are zero -> ReLU(0)=0, and the padded rows of w2 are zero.
    D1p = _round_up(D1, 128)
    w1p = _pad_cols(w_eff, D1p)                                   # (LC, D1p)
    b1p = _pad_cols(b_eff.reshape(1, D1), D1p)                    # (1, D1p)
    w2p = jnp.pad(w2, ((0, D1p - D1), (0, 0)))                    # (D1p, D2)
    b2p = b2.reshape(1, D2)                                       # (1, D2)
    if use_bf16:
        w1p = w1p.astype(jnp.bfloat16)
        w2p = w2p.astype(jnp.bfloat16)

    # Batch tiling (no input padding: ragged last block handled by Pallas).
    if batch_tile is None:
        TB = _choose_batch_tile(B)
    else:
        TB = min(int(batch_tile), B)
    if TB < B:
        TB = _round_up(TB, 8)
    grid = pl.cdiv(B, TB)

    # VMEM budget: double-buffered in/out tiles + weights + hidden temp.
    weight_bytes = (w1p.size * w1p.dtype.itemsize +
                    w2p.size * w2p.dtype.itemsize +
                    b1p.size * 4 + b2p.size * 4)
    tile_bytes = TB * (LC + D2) * 4
    temp_bytes = TB * D1p * 4 * 2
    vmem_limit = int(min(max(2 * tile_bytes + 2 * weight_bytes + temp_bytes
                             + (4 << 20), 32 << 20), 48 << 20))

    out = pl.pallas_call(
        functools.partial(_mlp_kernel, use_bf16=use_bf16),
        out_shape=jax.ShapeDtypeStruct((B, D2), jnp.float32),
        grid_spec=pltpu.PrefetchScalarGridSpec(
            num_scalar_prefetch=0,
            grid=(grid,),
            in_specs=[
                pl.BlockSpec((TB, LC), lambda i: (i, 0)),
                pl.BlockSpec((LC, D1p), lambda i: (0, 0)),
                pl.BlockSpec((1, D1p), lambda i: (0, 0)),
                pl.BlockSpec((D1p, D2), lambda i: (0, 0)),
                pl.BlockSpec((1, D2), lambda i: (0, 0)),
            ],
            out_specs=pl.BlockSpec((TB, D2), lambda i: (i, 0)),
        ),
        compiler_params=pltpu.CompilerParams(
            dimension_semantics=("parallel",),
            vmem_limit_bytes=vmem_limit,
        ),
    )(flat, w1p, b1p, w2p, b2p)

    return p0, out.reshape(B, 1, D2), w0


# ----------------------------------------------------------------------------
# Independent pure-JAX mirror of the PyTorch forward, for verification.
# ----------------------------------------------------------------------------
def _reference(x, conv_w, conv_b, w1, b1, w2, b2):
    B, L, C = x.shape
    xc = jnp.transpose(x, (0, 2, 1))                  # (B, C, L)
    xp = jnp.pad(xc, ((0, 0), (0, 0), (1, 1)))        # padding = 1
    y = conv_b[None, :, None]
    for k in range(3):
        y = y + jnp.einsum('oi,bit->bot', conv_w[:, :, k], xp[:, :, k:k + L])
    flat = jnp.transpose(y, (0, 2, 1)).reshape(B, L * C)
    h = jnp.maximum(flat @ w1 + b1, 0.0)
    o = jnp.maximum(h @ w2 + b2, 0.0)
    return x[:, 0:1, 1:4], o.reshape(B, 1, -1), jnp.zeros((B, 1, 3), x.dtype)


if __name__ == "__main__":
    # batch=2, his_len=8, channels=4, layer_dim = [his_len*4, 64, 32].
    B, L, C = 2, 8, 4
    layer_dim = [L * C, 64, 32]

    key = jax.random.PRNGKey(0)
    kx, kcw, kcb, kw1, kb1, kw2, kb2, kx2 = jax.random.split(key, 8)

    x = jax.random.normal(kx, (B, L, C), dtype=jnp.float32)

    # Deterministic synthetic parameters (PyTorch-like fan-in scaling).
    conv_w = jax.random.uniform(kcw, (4, 4, 3), jnp.float32, -1.0, 1.0) / jnp.sqrt(12.0)
    conv_b = jax.random.uniform(kcb, (4,), jnp.float32, -1.0, 1.0) / jnp.sqrt(12.0)
    w1 = jax.random.uniform(kw1, (layer_dim[0], layer_dim[1]), jnp.float32, -1.0, 1.0) / jnp.sqrt(layer_dim[0])
    b1 = jax.random.uniform(kb1, (layer_dim[1],), jnp.float32, -1.0, 1.0) / jnp.sqrt(layer_dim[0])
    w2 = jax.random.uniform(kw2, (layer_dim[1], layer_dim[2]), jnp.float32, -1.0, 1.0) / jnp.sqrt(layer_dim[1])
    b2 = jax.random.uniform(kb2, (layer_dim[2],), jnp.float32, -1.0, 1.0) / jnp.sqrt(layer_dim[1])

    # 1) Pallas path, exact-f32 dots, tiny batch (single block, grid of 1).
    run_f32 = jax.jit(functools.partial(slide_window_estimator,
                                        use_bf16=False, min_pallas_batch=0))
    p0, out, w0 = run_f32(x, conv_w, conv_b, w1, b1, w2, b2)
    jax.block_until_ready((p0, out, w0))
    assert p0.shape == (B, 1, 3)
    assert out.shape == (B, 1, layer_dim[-1])
    assert w0.shape == (B, 1, 3)
    rp0, rout, rw0 = _reference(x, conv_w, conv_b, w1, b1, w2, b2)
    assert jnp.allclose(p0, rp0)
    assert jnp.allclose(out, rout, atol=1e-4, rtol=1e-4)
    assert jnp.allclose(w0, rw0)

    # 2) Pallas path, bf16 dots, multi-tile ragged grid (B=300, TB=128).
    B2 = 300
    x2 = jax.random.normal(kx2, (B2, L, C), dtype=jnp.float32)
    run_bf16 = jax.jit(functools.partial(slide_window_estimator,
                                         batch_tile=128, use_bf16=True,
                                         min_pallas_batch=0))
    p0b, outb, w0b = run_bf16(x2, conv_w, conv_b, w1, b1, w2, b2)
    jax.block_until_ready((p0b, outb, w0b))
    assert outb.shape == (B2, 1, layer_dim[-1])
    rp0b, routb, rw0b = _reference(x2, conv_w, conv_b, w1, b1, w2, b2)
    assert jnp.allclose(p0b, rp0b)
    assert jnp.allclose(outb, routb, atol=7.5e-2, rtol=5e-2)   # bf16 operands
    assert jnp.allclose(w0b, rw0b)

    # 3) Small-batch XLA fast path (default threshold skips pallas_call).
    p0c, outc, w0c = jax.jit(slide_window_estimator)(x, conv_w, conv_b, w1, b1, w2, b2)
    jax.block_until_ready((p0c, outc, w0c))
    assert jnp.allclose(outc, rout, atol=1e-4, rtol=1e-4)

    print("KERNEL_OK")
</pallas_src>

<mosaic_0001>
module attributes {stable_mosaic.version = 11 : i64} {
  func.func @_mlp_kernel(%arg0: i32, %arg1: memref<2x32xf32, #tpu.memory_space<vmem>>, %arg2: memref<32x128xf32, #tpu.memory_space<vmem>>, %arg3: memref<1x128xf32, #tpu.memory_space<vmem>>, %arg4: memref<128x32xf32, #tpu.memory_space<vmem>>, %arg5: memref<1x32xf32, #tpu.memory_space<vmem>>, %arg6: memref<2x32xf32, #tpu.memory_space<vmem>>) attributes {dimension_semantics = [#tpu.dimension_semantics<parallel>], iteration_bounds = array<i64: 1>, scalar_prefetch = 0 : i64, scratch_operands = 0 : i64, tpu.core_type = #tpu.core_type<tc>, window_params = [{transform_indices = @transform_0, window_bounds = array<i64: 2, 32>}, {pipeline_mode = #tpu.pipeline_mode<synchronous>, transform_indices = @transform_1, window_bounds = array<i64: 32, 128>}, {pipeline_mode = #tpu.pipeline_mode<synchronous>, transform_indices = @transform_2, window_bounds = array<i64: 1, 128>}, {pipeline_mode = #tpu.pipeline_mode<synchronous>, transform_indices = @transform_3, window_bounds = array<i64: 128, 32>}, {pipeline_mode = #tpu.pipeline_mode<synchronous>, transform_indices = @transform_4, window_bounds = array<i64: 1, 32>}, {transform_indices = @transform_5, window_bounds = array<i64: 2, 32>}]} {
    %c0 = arith.constant 0 : index
    %c0_0 = arith.constant 0 : index
    %0 = vector.load %arg1[%c0, %c0_0] : memref<2x32xf32, #tpu.memory_space<vmem>>, vector<2x32xf32>
    %c0_1 = arith.constant 0 : index
    %c0_2 = arith.constant 0 : index
    %1 = vector.load %arg2[%c0_1, %c0_2] : memref<32x128xf32, #tpu.memory_space<vmem>>, vector<32x128xf32>
    %cst = arith.constant dense<0.000000e+00> : vector<2x128xf32>
    %2 = tpu.matmul %0, %1, %cst {dimension_numbers = #tpu.dot_dimension_numbers<[1], [0], [0], [1], [0, 0, 1, 1], [], []>, precision = #tpu.contract_precision<fp32>} : vector<2x32xf32>, vector<32x128xf32>, vector<2x128xf32> -> vector<2x128xf32>
    %c0_3 = arith.constant 0 : index
    %c0_4 = arith.constant 0 : index
    %3 = vector.load %arg3[%c0_3, %c0_4] : memref<1x128xf32, #tpu.memory_space<vmem>>, vector<1x128xf32>
    %4 = vector.broadcast %3 : vector<1x128xf32> to vector<2x128xf32>
    %5 = arith.addf %2, %4 : vector<2x128xf32>
    %cst_5 = arith.constant 0.000000e+00 : f32
    %6 = vector.broadcast %cst_5 : f32 to vector<2x128xf32>
    %7 = arith.maximumf %5, %6 : vector<2x128xf32>
    %c0_6 = arith.constant 0 : index
    %c0_7 = arith.constant 0 : index
    %8 = vector.load %arg4[%c0_6, %c0_7] : memref<128x32xf32, #tpu.memory_space<vmem>>, vector<128x32xf32>
    %cst_8 = arith.constant dense<0.000000e+00> : vector<2x32xf32>
    %9 = tpu.matmul %7, %8, %cst_8 {dimension_numbers = #tpu.dot_dimension_numbers<[1], [0], [0], [1], [0, 0, 1, 1], [], []>, precision = #tpu.contract_precision<fp32>} : vector<2x128xf32>, vector<128x32xf32>, vector<2x32xf32> -> vector<2x32xf32>
    %c0_9 = arith.constant 0 : index
    %c0_10 = arith.constant 0 : index
    %10 = vector.load %arg5[%c0_9, %c0_10] : memref<1x32xf32, #tpu.memory_space<vmem>>, vector<1x32xf32>
    %11 = vector.broadcast %10 : vector<1x32xf32> to vector<2x32xf32>
    %12 = arith.addf %9, %11 : vector<2x32xf32>
    %cst_11 = arith.constant 0.000000e+00 : f32
    %13 = vector.broadcast %cst_11 : f32 to vector<2x32xf32>
    %14 = arith.maximumf %12, %13 : vector<2x32xf32>
    %c0_12 = arith.constant 0 : index
    %c0_13 = arith.constant 0 : index
    %15 = vector.load %arg6[%c0_12, %c0_13] : memref<2x32xf32, #tpu.memory_space<vmem>>, vector<2x32xf32>
    tpu.vector_store %arg6[%c0_12, %c0_13], %14 {strides = array<i32>} : memref<2x32xf32, #tpu.memory_space<vmem>>, vector<2x32xf32>,
    return
  }
  func.func @transform_0(%arg0: i32) -> (i32, i32) {
    %c0_i32 = arith.constant 0 : i32
    %c0_i32_0 = arith.constant 0 : i32
    return %arg0, %c0_i32 : i32, i32
  }
  func.func @transform_1(%arg0: i32) -> (i32, i32) {
    %c0_i32 = arith.constant 0 : i32
    %c0_i32_0 = arith.constant 0 : i32
    %c0_i32_1 = arith.constant 0 : i32
    return %c0_i32, %c0_i32_0 : i32, i32
  }
  func.func @transform_2(%arg0: i32) -> (i32, i32) {
    %c0_i32 = arith.constant 0 : i32
    %c0_i32_0 = arith.constant 0 : i32
    %c0_i32_1 = arith.constant 0 : i32
    return %c0_i32, %c0_i32_0 : i32, i32
  }
  func.func @transform_3(%arg0: i32) -> (i32, i32) {
    %c0_i32 = arith.constant 0 : i32
    %c0_i32_0 = arith.constant 0 : i32
    %c0_i32_1 = arith.constant 0 : i32
    return %c0_i32, %c0_i32_0 : i32, i32
  }
  func.func @transform_4(%arg0: i32) -> (i32, i32) {
    %c0_i32 = arith.constant 0 : i32
    %c0_i32_0 = arith.constant 0 : i32
    %c0_i32_1 = arith.constant 0 : i32
    return %c0_i32, %c0_i32_0 : i32, i32
  }
  func.func @transform_5(%arg0: i32) -> (i32, i32) {
    %c0_i32 = arith.constant 0 : i32
    %c0_i32_0 = arith.constant 0 : i32
    return %arg0, %c0_i32 : i32, i32
  }
}

</mosaic_0001>

<bundles_post_ra>
// kernel: tile.8
= control target key start
LH: loop header
LB: loop body
LE: loop exit
PB: predicated region body
PF: predicated region fallthrough
CT: control target
= control target key end

     0   :  { %s22_s0 = inlined_call_operand.vmem [shape: f32[4], index: 0, kind: input, shape index: {}]   ;;  %s23_s1 = inlined_call_operand.vmem [shape: f32[8,4], index: 1, kind: output, shape index: {}]  }
   0x1   :  { %v4_v0 = vld [vmem:[%s22_s0] ss:$0 sm:$0xff] }
   0x2   :  { %5 = vst [vmem:[%s23_s1] sm:$0xff] %v4_v0 }

// kernel: tile.9
= control target key start
LH: loop header
LB: loop body
LE: loop exit
PB: predicated region body
PF: predicated region fallthrough
CT: control target
= control target key end

     0   :  { %s67_s10 = smov 28   ;;  %s68_s11 = smov 20   ;;  %vm3_vm0 = vcmask 31744   ;;  %vm9_vm1 = vcmask 261344   ;;  %vm15_vm2 = vcmask 228544   ;;  %vm21_vm3 = vcmask 195744   ;;  %s111_s0 = inlined_call_operand.vmem [shape: f32[8,4], index: 0, kind: input, shape index: {}]   ;;  %s112_s1 = inlined_call_operand.vmem [shape: f32[32], index: 1, kind: output, shape index: {}]  }
   0x1   :  { %v53_v0 = vld [vmem:[%s111_s0 + $0x7] sm:$0x1]   ;;  %v55_v1 = vld [vmem:[%s111_s0 + $0x5] sm:$0x1]   ;;  %v54_v2 = vld [vmem:[%s111_s0 + $0x6] sm:$0x1]  }
   0x2   :  { %7 = vrot.lane.b32.xlu0 %v53_v0, %s67_s10  ;;  %19 = vrot.lane.b32.xlu1 %v55_v1, %s68_s11  ;;  %v56_v3 = vld [vmem:[%s111_s0 + $0x4] sm:$0x1]   ;;  %v2_v4 = vld [vmem:[%s111_s0] sm:$0x1]   ;;  %s69_s18 = smov 24   ;;  %s70_s19 = smov 16  }
   0x3   :  { %4 = vst.msk [vmem:[#allocation0] sm:$0x1] %vm3_vm0, %v2_v4   ;;  %v57_v5 = vld [vmem:[%s111_s0 + $0x3] sm:$0x1]   ;;  %v58_v6 = vld [vmem:[%s111_s0 + $0x2] sm:$0x1]  }
   0x4   :  { %s71_s24 = smov 12   ;;  %s72_s25 = smov 8   ;;  %v59_v7 = vld [vmem:[%s111_s0 + $0x1] sm:$0x1]   ;;  %vm27_vm4 = vcmask 162944   ;;  %vm33_vm5 = vcmask 130144  }
   0x5   :  { %s73_s0 = smov 4   ;;  %vm39_vm6 = vcmask 97344   ;;  %vm45_vm7 = vcmask 64544  }
   0x6   :  { %13 = vrot.lane.b32.xlu0 %v54_v2, %s69_s18  ;;  %25 = vrot.lane.b32.xlu1 %v56_v3, %s70_s19 }
   0xa   :  { %31 = vrot.lane.b32.xlu0 %v57_v5, %s71_s24  ;;  %37 = vrot.lane.b32.xlu1 %v58_v6, %s72_s25 }
   0xe   :  { %43 = vrot.lane.b32.xlu0 %v59_v7, %s73_s0 }
  0x74   :  { %v8_v8 = vpop.permute.xlu0 %7   ;;  %v20_v9 = vpop.permute.xlu1 %19  }
  0x75   :  { %10 = vst.msk [vmem:[#allocation0] sm:$0x1] %vm9_vm1, %v8_v8  }
  0x78   :  { %v14_v10 = vpop.permute.xlu0 %13   ;;  %v26_v11 = vpop.permute.xlu1 %25  }
  0x79   :  { %16 = vst.msk [vmem:[#allocation0] sm:$0x1] %vm15_vm2, %v14_v10  }
  0x7a   :  { %22 = vst.msk [vmem:[#allocation0] sm:$0x1] %vm21_vm3, %v20_v9  }
  0x7b   :  { %28 = vst.msk [vmem:[#allocation0] sm:$0x1] %vm27_vm4, %v26_v11  }
  0x7c   :  { %v32_v12 = vpop.permute.xlu0 %31   ;;  %v38_v13 = vpop.permute.xlu1 %37  }
  0x7d   :  { %34 = vst.msk [vmem:[#allocation0] sm:$0x1] %vm33_vm5, %v32_v12  }
  0x7e   :  { %40 = vst.msk [vmem:[#allocation0] sm:$0x1] %vm39_vm6, %v38_v13  }
  0x80   :  { %v44_v14 = vpop.permute.xlu0 %43  }
  0x81   :  { %46 = vst.msk [vmem:[#allocation0] sm:$0x1] %vm45_vm7, %v44_v14  }
  0x88   :  { %v50_v15 = vld [vmem:[#allocation0] sm:$0x1] }
  0x89   :  { %52 = vst [vmem:[%s112_s1] sm:$0x1] %v50_v15 }

// kernel: slide_window_estimator.1
= control target key start
LH: loop header
LB: loop body
LE: loop exit
PB: predicated region body
PF: predicated region fallthrough
CT: control target
= control target key end

     0   :  { %v1843_v3 = vmov 0.0|0.0   ;;  %vm1844_vm0 = vmmov 0   ;;  %v1845_v8 = vmov 0.0   ;;  %vm33_vm1 = vcmask 261120   ;;  %s2358_s0 = inlined_call_operand.vmem [shape: f32[2,32], index: 0, kind: input, shape index: {}]   ;;  %s2359_s1 = inlined_call_operand.vmem [shape: f32[32,128], index: 1, kind: input, shape index: {}]   ;;  %s2360_s2 = inlined_call_operand.vmem [shape: f32[1,128], index: 2, kind: input, shape index: {}]   ;;  %s2361_s3 = inlined_call_operand.vmem [shape: f32[128,32], index: 3, kind: input, shape index: {}]   ;;  %s2362_s4 = inlined_call_operand.vmem [shape: f32[1,32], index: 4, kind: input, shape index: {}]   ;;  %s2363_s5 = inlined_call_operand.hbm [shape: f32[2,32], index: 5, kind: output, shape index: {}]  }
   0x1   :  { %v22_v0 = vld [vmem:[%s2359_s1] sm:$0xff]  ;;  %v23_v1 = vld [vmem:[%s2359_s1 + $0x8] sm:$0xff]  ;;  %v24_v2 = vld [vmem:[%s2359_s1 + $0x10] sm:$0xff]  ;;  %1614 = vmatprep.subr.bf16.mxu0 %v1843_v3  ;;  %1346 = vmatprep.mubr.msk.f32.mxu0 %vm1844_vm0, %v1845_v8 }
   0x2   :  { %v38_v4 = vand.u32 4294901760, %v22_v0  ;;  %v41_v5 = vand.u32 4294901760, %v23_v1  ;;  %v25_v6 = vld [vmem:[%s2359_s1 + $0x18] sm:$0xff]  ;;  %v44_v7 = vand.u32 4294901760, %v24_v2  ;;  %v21_v9 = vld [vmem:[%s2358_s0] sm:$0x3]  ;;  %1698 = vmatprep.subr.bf16.mxu1 %v1843_v3  ;;  %1506 = vmatprep.mubr.msk.f32.mxu1 %vm1844_vm0, %v1845_v8 }
   0x3   :  { %v47_v10 = vand.u32 4294901760, %v25_v6  ;;  %v1899_v11 = vld [vmem:[%s2361_s3] sm:$0xff]  ;;  %v1914_v16 = vld [vmem:[%s2361_s3 + $0x8] sm:$0xff]  ;;  %v35_v19 = vsel %vm33_vm1, %v21_v9, 0  ;;  %v1945_v31 = vld [vmem:[%s2361_s3 + $0x10] sm:$0xff] }
   0x4   :  { %v1903_v12 = vpack.c.bf16 %v41_v5, %v38_v4  ;;  %v1905_v13 = vsub.f32 %v22_v0, %v38_v4  ;;  %v1907_v14 = vsub.f32 %v23_v1, %v41_v5  ;;  %v1909_v15 = vsub.f32 %v24_v2, %v44_v7 }
   0x5   :  { %v1916_v17 = vpack.c.bf16 %v47_v10, %v44_v7  ;;  %v1918_v18 = vsub.f32 %v25_v6, %v47_v10  ;;  %v547_v20 = vand.u32 4294901760, %v1899_v11  ;;  %v1922_v21 = vand.u32 4294901760, %v35_v19 }
   0x6   :  { %1616 = vmatpush3.bf16.msra.mxu0 %v1903_v12  ;;  %v119_v22 = vand.u32 4294901760, %v1905_v13  ;;  %v126_v23 = vand.u32 4294901760, %v1907_v14  ;;  %v133_v24 = vand.u32 4294901760, %v1909_v15  ;;  %v550_v26 = vand.u32 4294901760, %v1914_v16 }
   0x7   :  { %1617 = vmatprep.subr.bf16.mxu0 %v1843_v3  ;;  %v140_v25 = vand.u32 4294901760, %v1918_v18  ;;  %v1931_v27 = vsub.f32 %v35_v19, %v1922_v21 }
   0x8   :  { %v120_v28 = vsub.f32 %v1905_v13, %v119_v22  ;;  %v127_v29 = vsub.f32 %v1907_v14, %v126_v23  ;;  %v134_v30 = vsub.f32 %v1909_v15, %v133_v24 }
   0x9   :  { %10 = vsyncpa [#allocation3], 0  ;;  %v141_v32 = vsub.f32 %v1918_v18, %v140_v25  ;;  %v1953_v33 = vsub.f32 %v1899_v11, %v547_v20  ;;  %v1958_v34 = vld [vmem:[%s2361_s3 + $0x18] sm:$0xff]  ;;  %v108_v35 = vand.u32 4294901760, %v1931_v27  ;;  %v1966_v38 = vsub.f32 %v1914_v16, %v550_v26  ;;  %v1972_v40 = vld [vmem:[%s2361_s3 + $0x20] sm:$0xff]  ;;  %s1846_s8 = smov [#allocation2]  }
   0xa   :  { %1619 = vmatpush3.bf16.msra.mxu0 %v1916_v17  ;;  %v121_v36 = vand.u32 4294901760, %v120_v28  ;;  %v128_v37 = vand.u32 4294901760, %v127_v29  ;;  %v553_v39 = vand.u32 4294901760, %v1945_v31  ;;  %v1977_v41 = vld [vmem:[%s2361_s3 + $0x28] sm:$0xff]  ;;  %v135_v43 = vand.u32 4294901760, %v134_v30  ;;  %v1986_v45 = vld [vmem:[%s2361_s3 + $0x30] sm:$0xff] }
   0xb   :  { %1620 = vmatprep.subr.bf16.mxu0 %v1843_v3  ;;  %v109_v42 = vsub.f32 %v1931_v27, %v108_v35  ;;  %v556_v44 = vand.u32 4294901760, %v1958_v34  ;;  %v1991_v46 = vld [vmem:[%s2361_s3 + $0x38] sm:$0xff]  ;;  %v142_v48 = vand.u32 4294901760, %v141_v32  ;;  %v1699_v49 = vpack.c.bf16 %v1966_v38, %v1953_v33  ;;  %v2012_v57 = vld [vmem:[%s2361_s3 + $0x40] sm:$0xff]  ;;  %v2030_v61 = vld [vmem:[%s2361_s3 + $0x48] sm:$0xff]  ;;  %s1196_s9 = sshll.u32 %s1846_s8, 4  ;;  %s1197_s9 = int_to_ptr.vmem [resolvable:$true] %s1196_s9 }
   0xc   :  { %v1621_v47 = vpack.c.bf16 %v128_v37, %v121_v36  ;;  %v1998_v50 = vsub.f32 %v1945_v31, %v553_v39  ;;  %v559_v53 = vand.u32 4294901760, %v1972_v40  ;;  %v562_v54 = vand.u32 4294901760, %v1977_v41  ;;  %v2052_v5 = vld [vmem:[%s2361_s3 + $0x50] sm:$0xff]  ;;  %v2058_v6 = vld [vmem:[%s2361_s3 + $0x58] sm:$0xff]  ;;  %v535_v16 = vld [vmem:[%s2361_s3 + $0x60] sm:$0xff]  ;;  %s1819_s10 = scalar_lea.vmem %s1197_s9, 32  ;;  %p1824_p1 = scmp.lt.s32.totalorder %s1197_s9, %s1197_s9 }
   0xd   :  { %v110_v51 = vand.u32 4294901760, %v109_v42  ;;  %v2003_v52 = vsub.f32 %v1958_v34, %v556_v44  ;;  %1700 = vmatpush3.bf16.msra.mxu1 %v1699_v49  ;;  %v565_v55 = vand.u32 4294901760, %v1986_v45  ;;  %v568_v56 = vand.u32 4294901760, %v1991_v46  ;;  %p1820_p0 = scmp.ne.s32.totalorder %s1197_s9, %s1819_s10  ;;  %p1825_p2 = scmp.lt.s32.totalorder %s1819_s10, %s1819_s10 }
   0xe   :  { %1701 = vmatprep.subr.bf16.mxu1 %v1843_v3  ;;  %v2020_v59 = vsub.f32 %v1972_v40, %v559_v53  ;;  %v2025_v60 = vsub.f32 %v1977_v41, %v562_v54  ;;  %v1624_v62 = vpack.c.bf16 %v142_v48, %v135_v43  ;;  %v571_v63 = vand.u32 4294901760, %v2012_v57 }
   0xf   :  { %1347 = vmatmul.mubr.f32.vlgmr.msra.gmra.mrb[0].mxu0 %v110_v51  ;;  %v1702_v58 = vpack.c.bf16 %v2003_v52, %v1998_v50  ;;  %v2041_v1 = vsub.f32 %v1986_v45, %v565_v55  ;;  %v2046_v2 = vsub.f32 %v1991_v46, %v568_v56  ;;  %v574_v4 = vand.u32 4294901760, %v2030_v61  ;;  %p1826_p3 = por %p1825_p2, %p1824_p1 }
  0x10   :  { %1622 = vmatpush3.bf16.msra.mxu0 %v1621_v47  ;;  %1357 = vmatprep.mubr.msk.f32.mxu0 %vm1844_vm0, %v1845_v8  ;;  %v1705_v0 = vpack.c.bf16 %v2025_v60, %v2020_v59  ;;  %v1627_v7 = vpack.c.bf16 %v1907_v14, %v1905_v13  ;;  %v577_v9 = vand.u32 4294901760, %v2052_v5  ;;  %v2069_v19 = vsub.f32 %v2012_v57, %v571_v63 }
  0x11   :  { %1623 = vmatprep.subr.bf16.mxu0 %v1843_v3  ;;  %1703 = vmatpush3.bf16.msra.mxu1 %v1702_v58  ;;  %v1708_v10 = vpack.c.bf16 %v2046_v2, %v2041_v1  ;;  %v2074_v28 = vsub.f32 %v2030_v61, %v574_v4  ;;  %v580_v29 = vand.u32 4294901760, %v2058_v6  ;;  %v1630_v30 = vpack.c.bf16 %v1918_v18, %v1909_v15  ;;  %p1827_p4 = pnand %p1826_p3, %p1820_p0 }
  0x12   :  { %1704 = vmatprep.subr.bf16.mxu1 %v1843_v3  ;;  %v2089_v36 = vsub.f32 %v2052_v5, %v577_v9  ;;  %v1639_v43 = vpack.c.bf16 %v126_v23, %v119_v22  ;;  %v1642_v47 = vpack.c.bf16 %v140_v25, %v133_v24  ;;  %v2133_v13 = vpack.c.bf16 %v550_v26, %v547_v20  ;;  %v537_v23 = vld [vmem:[%s2361_s3 + $0x70] sm:$0xff]  ;;  %v538_v24 = vld [vmem:[%s2361_s3 + $0x78] sm:$0xff] }
  0x13   :  { %v1711_v32 = vpack.c.bf16 %v2074_v28, %v2069_v19  ;;  %v2094_v37 = vsub.f32 %v2058_v6, %v580_v29  ;;  %v2152_v11 = vpack.c.bf16 %v562_v54, %v559_v53  ;;  %v2160_v14 = vpack.c.bf16 %v568_v56, %v565_v55 }
  0x14   :  { %1625 = vmatpush3.bf16.msra.mxu0 %v1624_v62  ;;  %v2168_v15 = vpack.c.bf16 %v574_v4, %v571_v63  ;;  %v583_v18 = vand.u32 4294901760, %v535_v16  ;;  %v589_v26 = vand.u32 4294901760, %v537_v23  ;;  %v2189_v31 = vpack.c.bf16 %v580_v29, %v577_v9  ;;  %v1204_v4 = vld [vmem:[%s2360_s2] ss:$0 sm:$0xff] }
  0x15   :  { %1626 = vmatprep.subr.bf16.mxu0 %v1843_v3  ;;  %1706 = vmatpush3.bf16.msra.mxu1 %v1705_v0  ;;  %v1714_v42 = vpack.c.bf16 %v2094_v37, %v2089_v36  ;;  %v640_v5 = vand.u32 4294901760, %v1953_v33  ;;  %v647_v6 = vand.u32 4294901760, %v1966_v38  ;;  %vm1188_vm2 = vcmask 254976  }
  0x16   :  { %1707 = vmatprep.subr.bf16.mxu1 %v1843_v3  ;;  %v737_v34 = vsub.f32 %v537_v23, %v589_v26 }
  0x17   :  { %1358 = vmatmul.mubr.f32.vlgmr.msra.gmra.mrb[0].mxu0 %v1922_v21 }
  0x18   :  { %1628 = vmatpush3.bf16.msra.mxu0 %v1627_v7  ;;  %1368 = vmatprep.mubr.msk.f32.mxu0 %vm1844_vm0, %v1845_v8  ;;  %v738_v53 = vand.u32 4294901760, %v737_v34 }
  0x19   :  { %1629 = vmatprep.subr.bf16.mxu0 %v1843_v3  ;;  %1709 = vmatpush3.bf16.msra.mxu1 %v1708_v10 }
  0x1a   :  { %1710 = vmatprep.subr.bf16.mxu1 %v1843_v3  ;;  %v739_v56 = vsub.f32 %v737_v34, %v738_v53 }
  0x1c   :  { %1631 = vmatpush3.bf16.msra.mxu0 %v1630_v30  ;;  %v740_v58 = vand.u32 4294901760, %v739_v56  ;;  %v641_v30 = vsub.f32 %v1953_v33, %v640_v5  ;;  %v696_v56 = vand.u32 4294901760, %v2069_v19 }
  0x1d   :  { %1632 = vmatprep.subr.bf16.mxu0 %v1843_v3  ;;  %1712 = vmatpush3.bf16.msra.mxu1 %v1711_v32  ;;  %v648_v32 = vsub.f32 %v1966_v38, %v647_v6 }
  0x1e   :  { %1713 = vmatprep.subr.bf16.mxu1 %v1843_v3 }
  0x1f   :  { %1369 = vmatmul.mubr.f32.vlgmr.msra.gmra.mrb[0].mxu0 %v1931_v27  ;;  %v592_v27 = vand.u32 4294901760, %v538_v24 }
  0x20   :  { %1634 = vmatpush3.bf16.msra.mxu0 %v1903_v12  ;;  %1379 = vmatprep.mubr.msk.f32.mxu0 %vm1844_vm0, %v1845_v8 }
  0x21   :  { %1635 = vmatprep.subr.bf16.mxu0 %v1843_v3  ;;  %1715 = vmatpush3.bf16.msra.mxu1 %v1714_v42  ;;  %v2199_v41 = vpack.c.bf16 %v592_v27, %v589_v26  ;;  %v654_v42 = vand.u32 4294901760, %v1998_v50 }
  0x22   :  { %1716 = vmatprep.subr.bf16.mxu1 %v1843_v3 }
  0x24   :  { %1637 = vmatpush3.bf16.msra.mxu0 %v1916_v17 }
  0x25   :  { %1638 = vmatprep.subr.bf16.mxu0 %v1843_v3 }
  0x27   :  { %1380 = vmatmul.mubr.f32.vlgmr.msra.gmra.mrb[0].mxu0 %v108_v35  ;;  %v744_v35 = vsub.f32 %v538_v24, %v592_v27 }
  0x28   :  { %1640 = vmatpush3.bf16.msra.mxu0 %v1639_v43  ;;  %1390 = vmatprep.mubr.msk.f32.mxu0 %vm1844_vm0, %v1845_v8  ;;  %v661_v43 = vand.u32 4294901760, %v2003_v52 }
  0x29   :  { %1641 = vmatprep.subr.bf16.mxu0 %v1843_v3  ;;  %v745_v54 = vand.u32 4294901760, %v744_v35 }
  0x2a   :  { %v662_v23 = vsub.f32 %v2003_v52, %v661_v43 }
  0x2b   :  { %v746_v57 = vsub.f32 %v744_v35, %v745_v54  ;;  %v2209_v0 = vpack.c.bf16 %v745_v54, %v738_v53 }
  0x2c   :  { %1643 = vmatpush3.bf16.msra.mxu0 %v1642_v47 }
  0x2d   :  { %1644 = vmatprep.subr.bf16.mxu0 %v1843_v3  ;;  %v747_v61 = vand.u32 4294901760, %v746_v57  ;;  %v703_v57 = vand.u32 4294901760, %v2074_v28 }
  0x2f   :  { %1391 = vmatmul.mubr.f32.vlgmr.msra.gmra.mrb[0].mxu0 %v1922_v21  ;;  %v2205_v62 = vpack.c.bf16 %v747_v61, %v740_v58 }
  0x30   :  { %1646 = vmatpush3.bf16.msra.mxu0 %v1903_v12  ;;  %1401 = vmatprep.mubr.msk.f32.mxu0 %vm1844_vm0, %v1845_v8  ;;  %v2142_v12 = vpack.c.bf16 %v556_v44, %v553_v39  ;;  %v1720_v39 = vpack.c.bf16 %v744_v35, %v737_v34  ;;  %v682_v34 = vand.u32 4294901760, %v2041_v1  ;;  %v689_v35 = vand.u32 4294901760, %v2046_v2 }
  0x31   :  { %1647 = vmatprep.subr.bf16.mxu0 %v1843_v3 }
  0x32   :  { %v690_v53 = vsub.f32 %v2046_v2, %v689_v35  ;;  %v1756_v38 = vpack.c.bf16 %v689_v35, %v682_v34 }
  0x34   :  { %1649 = vmatpush3.bf16.msra.mxu0 %v1916_v17  ;;  %v536_v17 = vld [vmem:[%s2361_s3 + $0x68] sm:$0xff] }
  0x35   :  { %1650 = vmatprep.subr.bf16.mxu0 %v1843_v3  ;;  %v586_v20 = vand.u32 4294901760, %v536_v17 }
  0x37   :  { %1402 = vmatmul.mubr.f32.vlgmr.msra.gmra.mrb[0].mxu0 %v1922_v21  ;;  %v723_v21 = vsub.f32 %v535_v16, %v583_v18  ;;  %v730_v22 = vsub.f32 %v536_v17, %v586_v20  ;;  %v2194_v40 = vpack.c.bf16 %v586_v20, %v583_v18  ;;  %v668_v16 = vand.u32 4294901760, %v2020_v59 }
  0x38   :  { %1652 = vmatpush3.bf16.msra.mxu0 %v2133_v13  ;;  %1436 = vmatprep.mubr.msk.f32.mxu0 %vm1844_vm0, %v1845_v8  ;;  %v675_v18 = vand.u32 4294901760, %v2025_v60  ;;  %v642_v20 = vand.u32 4294901760, %v641_v30 }
  0x39   :  { %1653 = vmatprep.subr.bf16.mxu0 %v1843_v3  ;;  %v1717_v25 = vpack.c.bf16 %v730_v22, %v723_v21  ;;  %v724_v44 = vand.u32 4294901760, %v723_v21  ;;  %v731_v45 = vand.u32 4294901760, %v730_v22 }
  0x3a   :  { %v676_v27 = vsub.f32 %v2025_v60, %v675_v18  ;;  %v1753_v33 = vpack.c.bf16 %v675_v18, %v668_v16  ;;  %v1205_v60 = vld [vmem:[%s2362_s4] ss:$0 sm:$0xff] }
  0x3b   :  { %1718 = vmatpush3.bf16.msra.mxu1 %v1717_v25  ;;  %v725_v46 = vsub.f32 %v723_v21, %v724_v44  ;;  %v732_v48 = vsub.f32 %v730_v22, %v731_v45  ;;  %v2207_v63 = vpack.c.bf16 %v731_v45, %v724_v44  ;;  %v649_v21 = vand.u32 4294901760, %v648_v32 }
  0x3c   :  { %1655 = vmatpush3.bf16.msra.mxu0 %v2142_v12  ;;  %1719 = vmatprep.subr.bf16.mxu1 %v1843_v3  ;;  %v655_v22 = vsub.f32 %v1998_v50, %v654_v42  ;;  %v669_v25 = vsub.f32 %v2020_v59, %v668_v16  ;;  %v663_v45 = vand.u32 4294901760, %v662_v23  ;;  %v1759_v50 = vpack.c.bf16 %v703_v57, %v696_v56 }
  0x3d   :  { %1656 = vmatprep.subr.bf16.mxu0 %v1843_v3  ;;  %v726_v49 = vand.u32 4294901760, %v725_v46  ;;  %v733_v51 = vand.u32 4294901760, %v732_v48 }
  0x3e   :  { %v656_v44 = vand.u32 4294901760, %v655_v22  ;;  %v670_v48 = vand.u32 4294901760, %v669_v25  ;;  %v1750_v25 = vpack.c.bf16 %v661_v43, %v654_v42 }
  0x3f   :  { %1721 = vmatpush3.bf16.msra.mxu1 %v1720_v39  ;;  %v2203_v55 = vpack.c.bf16 %v733_v51, %v726_v49  ;;  %v1675_v39 = vpack.c.bf16 %v649_v21, %v642_v20  ;;  %v677_v49 = vand.u32 4294901760, %v676_v27  ;;  %v683_v51 = vsub.f32 %v2041_v1, %v682_v34 }
  0x40   :  { %1658 = vmatpush3.bf16.msra.mxu0 %v2152_v11  ;;  %1722 = vmatprep.subr.bf16.mxu1 %v1843_v3  ;;  %v1678_v54 = vpack.c.bf16 %v663_v45, %v656_v44 }
  0x41   :  { %1659 = vmatprep.subr.bf16.mxu0 %v1843_v3  ;;  %v1681_v58 = vpack.c.bf16 %v677_v49, %v670_v48  ;;  %v684_v61 = vand.u32 4294901760, %v683_v51 }
  0x44   :  { %1661 = vmatpush3.bf16.msra.mxu0 %v2160_v14 }
  0x45   :  { %1662 = vmatprep.subr.bf16.mxu0 %v1843_v3 }
  0x48   :  { %1664 = vmatpush3.bf16.msra.mxu0 %v2168_v15 }
  0x49   :  { %1665 = vmatprep.subr.bf16.mxu0 %v1843_v3 }
  0x4c   :  { %1667 = vmatpush3.bf16.msra.mxu0 %v2189_v31 }
  0x4d   :  { %1668 = vmatprep.subr.bf16.mxu0 %v1843_v3 }
  0x50   :  { %1670 = vmatpush3.bf16.msra.mxu0 %v2194_v40 }
  0x51   :  { %1671 = vmatprep.subr.bf16.mxu0 %v1843_v3 }
  0x54   :  { %1673 = vmatpush3.bf16.msra.mxu0 %v2199_v41 }
  0x55   :  { %1674 = vmatprep.subr.bf16.mxu0 %v1843_v3 }
 0x10a   :  { %v518_v7 = vpop.f32.mrb[0].mxu0 }
 0x10b   :  { %v1794_v9 = vadd.f32 %v1204_v4, %v518_v7  ;;  %v1403_v10 = vpop.f32.mrb[1].mxu0  ;;  %v691_v4 = vand.u32 4294901760, %v690_v53  ;;  %v697_v7 = vsub.f32 %v2069_v19, %v696_v56 }
 0x10c   :  { %v710_v10 = vand.u32 4294901760, %v2089_v36 }
 0x10d   :  { %v522_v29 = vmax.f32 %v1794_v9, 0.0  ;;  %v704_v9 = vsub.f32 %v2074_v28, %v703_v57  ;;  %v1684_v30 = vpack.c.bf16 %v691_v4, %v684_v61  ;;  %v698_v32 = vand.u32 4294901760, %v697_v7 }
 0x10e   :  { %v711_v21 = vsub.f32 %v2089_v36, %v710_v10 }
 0x10f   :  { %v2224_v47 = vand.u32 4294901760, %v522_v29  ;;  %v705_v20 = vand.u32 4294901760, %v704_v9 }
 0x110   :  { %v712_v22 = vand.u32 4294901760, %v711_v21 }
 0x111   :  { %v2228_v17 = vsub.f32 %v522_v29, %v2224_v47  ;;  %v717_v29 = vand.u32 4294901760, %v2094_v37  ;;  %v1687_v28 = vpack.c.bf16 %v705_v20, %v698_v32 }
 0x113   :  { %v629_v24 = vand.u32 4294901760, %v2228_v17  ;;  %1507 = vmatmul.mubr.f32.vlgmr.msra.gmra.mrb[0].mxu1 %v2228_v17  ;;  %v718_v19 = vsub.f32 %v2094_v37, %v717_v29  ;;  %v1747_v37 = vpack.c.bf16 %v647_v6, %v640_v5  ;;  %v1762_v52 = vpack.c.bf16 %v717_v29, %v710_v10 }
 0x114   :  { %1724 = vmatpush3.bf16.msra.mxu1 %v2133_v13  ;;  %1541 = vmatprep.mubr.msk.f32.mxu1 %vm1844_vm0, %v1845_v8 }
 0x115   :  { %v630_v26 = vsub.f32 %v2228_v17, %v629_v24  ;;  %1725 = vmatprep.subr.bf16.mxu1 %v1843_v3  ;;  %v719_v23 = vand.u32 4294901760, %v718_v19 }
 0x117   :  { %v631_v46 = vand.u32 4294901760, %v630_v26  ;;  %v1690_v36 = vpack.c.bf16 %v719_v23, %v712_v22 }
 0x118   :  { %1727 = vmatpush3.bf16.msra.mxu1 %v2142_v12 }
 0x119   :  { %1437 = vmatmul.mubr.f32.vlgmr.msra.gmra.mrb[2].mxu0 %v631_v46  ;;  %1728 = vmatprep.subr.bf16.mxu1 %v1843_v3 }
 0x11a   :  { %1676 = vmatpush3.bf16.msra.mxu0 %v1675_v39  ;;  %1471 = vmatprep.mubr.msk.f32.mxu0 %vm1844_vm0, %v1845_v8 }
 0x11b   :  { %1677 = vmatprep.subr.bf16.mxu0 %v1843_v3 }
 0x11c   :  { %1730 = vmatpush3.bf16.msra.mxu1 %v2152_v11 }
 0x11d   :  { %1731 = vmatprep.subr.bf16.mxu1 %v1843_v3 }
 0x11e   :  { %1679 = vmatpush3.bf16.msra.mxu0 %v1678_v54 }
 0x11f   :  { %1680 = vmatprep.subr.bf16.mxu0 %v1843_v3 }
 0x120   :  { %1733 = vmatpush3.bf16.msra.mxu1 %v2160_v14 }
 0x121   :  { %1734 = vmatprep.subr.bf16.mxu1 %v1843_v3 }
 0x122   :  { %1682 = vmatpush3.bf16.msra.mxu0 %v1681_v58 }
 0x123   :  { %1683 = vmatprep.subr.bf16.mxu0 %v1843_v3 }
 0x124   :  { %1736 = vmatpush3.bf16.msra.mxu1 %v2168_v15 }
 0x125   :  { %1737 = vmatprep.subr.bf16.mxu1 %v1843_v3 }
 0x126   :  { %1685 = vmatpush3.bf16.msra.mxu0 %v1684_v30 }
 0x127   :  { %1686 = vmatprep.subr.bf16.mxu0 %v1843_v3 }
 0x128   :  { %1739 = vmatpush3.bf16.msra.mxu1 %v2189_v31 }
 0x129   :  { %1740 = vmatprep.subr.bf16.mxu1 %v1843_v3 }
 0x12a   :  { %1688 = vmatpush3.bf16.msra.mxu0 %v1687_v28 }
 0x12b   :  { %1689 = vmatprep.subr.bf16.mxu0 %v1843_v3 }
 0x12c   :  { %1742 = vmatpush3.bf16.msra.mxu1 %v2194_v40 }
 0x12d   :  { %1743 = vmatprep.subr.bf16.mxu1 %v1843_v3 }
 0x12e   :  { %1691 = vmatpush3.bf16.msra.mxu0 %v1690_v36 }
 0x12f   :  { %1692 = vmatprep.subr.bf16.mxu0 %v1843_v3 }
 0x130   :  { %1745 = vmatpush3.bf16.msra.mxu1 %v2199_v41 }
 0x131   :  { %1746 = vmatprep.subr.bf16.mxu1 %v1843_v3 }
 0x132   :  { %1694 = vmatpush3.bf16.msra.mxu0 %v2203_v55 }
 0x133   :  { %1542 = vmatmul.mubr.f32.vlgmr.msra.gmra.mrb[0].mxu1 %v629_v24  ;;  %1695 = vmatprep.subr.bf16.mxu0 %v1843_v3 }
 0x134   :  { %1748 = vmatpush3.bf16.msra.mxu1 %v1747_v37  ;;  %1576 = vmatprep.mubr.msk.f32.mxu1 %vm1844_vm0, %v1845_v8 }
 0x135   :  { %1749 = vmatprep.subr.bf16.mxu1 %v1843_v3 }
 0x136   :  { %1697 = vmatpush3.bf16.msra.mxu0 %v2205_v62 }
 0x138   :  { %1751 = vmatpush3.bf16.msra.mxu1 %v1750_v25 }
 0x139   :  { %1472 = vmatmul.mubr.f32.vlgmr.msra.gmra.mrb[2].mxu0 %v2224_v47  ;;  %1752 = vmatprep.subr.bf16.mxu1 %v1843_v3 }
 0x13c   :  { %1754 = vmatpush3.bf16.msra.mxu1 %v1753_v33 }
 0x13d   :  { %1755 = vmatprep.subr.bf16.mxu1 %v1843_v3 }
 0x140   :  { %1757 = vmatpush3.bf16.msra.mxu1 %v1756_v38 }
 0x141   :  { %1758 = vmatprep.subr.bf16.mxu1 %v1843_v3 }
 0x144   :  { %1760 = vmatpush3.bf16.msra.mxu1 %v1759_v50 }
 0x145   :  { %1761 = vmatprep.subr.bf16.mxu1 %v1843_v3 }
 0x148   :  { %1763 = vmatpush3.bf16.msra.mxu1 %v1762_v52 }
 0x149   :  { %1764 = vmatprep.subr.bf16.mxu1 %v1843_v3 }
 0x14c   :  { %1766 = vmatpush3.bf16.msra.mxu1 %v2207_v63 }
 0x14d   :  { %1767 = vmatprep.subr.bf16.mxu1 %v1843_v3 }
 0x150   :  { %1769 = vmatpush3.bf16.msra.mxu1 %v2209_v0 }
 0x151   :  { %1770 = vmatprep.subr.bf16.mxu1 %v1843_v3 }
 0x153   :  { %1577 = vmatmul.mubr.f32.vlgmr.msra.gmra.mrb[0].mxu1 %v2224_v47 }
 0x154   :  { %1772 = vmatpush3.bf16.msra.mxu1 %v2133_v13  ;;  %1611 = vmatprep.mubr.msk.f32.mxu1 %vm1844_vm0, %v1845_v8 }
 0x155   :  { %1773 = vmatprep.subr.bf16.mxu1 %v1843_v3 }
 0x158   :  { %1775 = vmatpush3.bf16.msra.mxu1 %v2142_v12 }
 0x159   :  { %1776 = vmatprep.subr.bf16.mxu1 %v1843_v3 }
 0x15c   :  { %1778 = vmatpush3.bf16.msra.mxu1 %v2152_v11 }
 0x15d   :  { %1779 = vmatprep.subr.bf16.mxu1 %v1843_v3 }
 0x160   :  { %1781 = vmatpush3.bf16.msra.mxu1 %v2160_v14 }
 0x161   :  { %1782 = vmatprep.subr.bf16.mxu1 %v1843_v3 }
 0x164   :  { %1784 = vmatpush3.bf16.msra.mxu1 %v2168_v15 }
 0x165   :  { %1785 = vmatprep.subr.bf16.mxu1 %v1843_v3 }
 0x168   :  { %1787 = vmatpush3.bf16.msra.mxu1 %v2189_v31 }
 0x169   :  { %1788 = vmatprep.subr.bf16.mxu1 %v1843_v3 }
 0x16c   :  { %1790 = vmatpush3.bf16.msra.mxu1 %v2194_v40 }
 0x16d   :  { %1791 = vmatprep.subr.bf16.mxu1 %v1843_v3 }
 0x170   :  { %1793 = vmatpush3.bf16.msra.mxu1 %v2199_v41 }
 0x173   :  { %1612 = vmatmul.mubr.f32.vlgmr.msra.gmra.mrb[0].mxu1 %v2224_v47 }
 0x20c   :  { %v784_v8 = vpop.f32.mrb[2].mxu0 }
 0x20d   :  { %v1473_v59 = vpop.f32.mrb[3].mxu0  ;;  %v1795_v1 = vadd.f32 %v1205_v60, %v784_v8 }
 0x246   :  { %v1183_v2 = vpop.f32.mrb[0].mxu1 }
 0x247   :  { %v1796_v13 = vadd.f32 %v1795_v1, %v1183_v2  ;;  %v1613_v12 = vpop.f32.mrb[1].mxu1 }
 0x249   :  { %v1187_v11 = vmax.f32 %v1796_v13, 0.0 }
 0x24b   :  { %1189 = vst.msk [vmem:[#allocation2] sm:$0x3] %vm1188_vm2, %v1187_v11 }
 0x24c   :  { %1830 = shalt.err (!%p1827_p4)
}
 0x24d   :  { %s1831_s4 = scalar_lea.hbm %s2363_s5, 32 }
 0x24e   :  { %p1832_p5 = scmp.ne.s32.totalorder %s2363_s5, %s1831_s4  ;;  %p1835_p6 = scmp.lt.u32.totalorder %s1831_s4, %s2363_s5 }
 0x250   :  { %p1837_p7 = pnand %p1835_p6, %p1832_p5 }
 0x252   :  { %1840 = shalt.err (!%p1837_p7)
}
 0x253   :  { %1199 = dma.vmem_to_hbm [thread:$0]  %s1197_s9, 32, %s2363_s5, [#allocation3]  }
 0x254   :  { %1841 = dma.done.wait [#allocation3], 32  }
 0x255   :  { %1842 = vsyncadd [#allocation3], 4294967264 }
 0x256   :  { %1203 = vsyncpa [#allocation3], 1 }

</bundles_post_ra>
